<compile_context>
chip_gen: v7x
topology: tpu7x:2x2x1
jax: 0.10.0
libtpu: 0.0.40
codegen_flags: <defaults>
</compile_context>

<pallas_src>
import jax
import jax.numpy as jnp
from jax.experimental import pallas as pl
from jax.experimental.pallas import tpu as pltpu

LANE = 128
SUBLANE = 8


def _round_up(x, m):
    return ((x + m - 1) // m) * m


def iris_mlp_kernel(x_ref, w1_ref, b1_ref, w2_ref, b2_ref, w3_ref, b3_ref, o_ref):
    # One batch tile per grid step: three MXU matmuls fused with bias add + ReLU (VPU).
    x = x_ref[...]
    h1 = jnp.dot(x, w1_ref[...], preferred_element_type=jnp.float32) + b1_ref[...]
    h1 = jnp.maximum(h1, 0.0)
    h2 = jnp.dot(h1, w2_ref[...], preferred_element_type=jnp.float32) + b2_ref[...]
    h2 = jnp.maximum(h2, 0.0)
    out = jnp.dot(h2, w3_ref[...], preferred_element_type=jnp.float32) + b3_ref[...]
    o_ref[...] = out.astype(o_ref.dtype)


def iris_nn_forward(x, params, *, block_batch=512):
    w1, b1, w2, b2, w3, b3 = params
    batch, in_features = x.shape
    hidden = w1.shape[1]
    out_features = w3.shape[1]

    # Lane-pad hidden and output feature dims to 128 so stores / intermediates are
    # lane-dense. Zero padding is mathematically inert (relu(0)=0, 0-rows contribute 0).
    hid_p = _round_up(hidden, LANE)
    out_p = _round_up(out_features, LANE)

    w1p = jnp.pad(w1, ((0, 0), (0, hid_p - hidden)))
    b1p = jnp.pad(b1, ((0, 0), (0, hid_p - hidden)))
    w2p = jnp.pad(w2, ((0, hid_p - hidden), (0, hid_p - hidden)))
    b2p = jnp.pad(b2, ((0, 0), (0, hid_p - hidden)))
    w3p = jnp.pad(w3, ((0, hid_p - hidden), (0, out_p - out_features)))
    b3p = jnp.pad(b3, ((0, 0), (0, out_p - out_features)))

    # Batch tile: multiple of 8 (f32 sublane), capped so double-buffered x/out tiles
    # plus the ~130 KB of resident padded weights stay far under VMEM on all gens.
    tb = min(block_batch, _round_up(batch, SUBLANE))
    batch_p = _round_up(batch, tb)
    xp = jnp.pad(x, ((0, batch_p - batch), (0, 0)))

    grid = (batch_p // tb,)
    resident = lambda i: (0, 0)  # weights/biases: same block every step -> VMEM-resident

    out = pl.pallas_call(
        iris_mlp_kernel,
        out_shape=jax.ShapeDtypeStruct((batch_p, out_p), jnp.float32),
        grid=grid,
        in_specs=[
            pl.BlockSpec((tb, in_features), lambda i: (i, 0)),  # x: tiled along batch
            pl.BlockSpec(w1p.shape, resident),
            pl.BlockSpec(b1p.shape, resident),
            pl.BlockSpec(w2p.shape, resident),
            pl.BlockSpec(b2p.shape, resident),
            pl.BlockSpec(w3p.shape, resident),
            pl.BlockSpec(b3p.shape, resident),
        ],
        out_specs=pl.BlockSpec((tb, out_p), lambda i: (i, 0)),
        compiler_params=pltpu.CompilerParams(
            # Batch tiles are independent: lets v7x shard them across its 2 TCs.
            dimension_semantics=("parallel",)),
    )(xp, w1p, b1p, w2p, b2p, w3p, b3p)

    return out[:batch, :out_features]


def init_params(key, input_size, hidden, output_size):
    # Deterministic init mimicking nn.Linear's U(-1/sqrt(fan_in), 1/sqrt(fan_in)).
    # Weights stored (in_features, out_features) so y = x @ W + b (== PyTorch x @ W.T + b).
    ks = jax.random.split(key, 6)

    def lin(kw, kb, fan_in, fan_out):
        bound = 1.0 / jnp.sqrt(fan_in)
        w = jax.random.uniform(kw, (fan_in, fan_out), jnp.float32, -bound, bound)
        b = jax.random.uniform(kb, (1, fan_out), jnp.float32, -bound, bound)
        return w, b

    w1, b1 = lin(ks[0], ks[1], input_size, hidden)
    w2, b2 = lin(ks[2], ks[3], hidden, hidden)
    w3, b3 = lin(ks[4], ks[5], hidden, output_size)
    return (w1, b1, w2, b2, w3, b3)


def reference_forward(x, params):
    w1, b1, w2, b2, w3, b3 = params
    h1 = jnp.maximum(x @ w1 + b1, 0.0)
    h2 = jnp.maximum(h1 @ w2 + b2, 0.0)
    return h2 @ w3 + b3


if __name__ == "__main__":
    input_size = 4    # Iris features
    output_size = 3   # Iris classes
    hidden = 64
    batch = 8

    key = jax.random.PRNGKey(0)
    kx, kp = jax.random.split(key)
    x = jax.random.normal(kx, (batch, input_size), jnp.float32)
    params = init_params(kp, input_size, hidden, output_size)

    out = iris_nn_forward(x, params)
    out = jax.block_until_ready(out)

    ref = reference_forward(x, params)
    assert out.shape == (batch, output_size)
    assert jnp.allclose(out, ref, atol=1e-5, rtol=1e-5)

    # Also exercise the batch-tiled path (multiple grid steps + ragged batch).
    x_big = jax.random.normal(kx, (1030, input_size), jnp.float32)
    out_big = jax.block_until_ready(iris_nn_forward(x_big, params))
    assert out_big.shape == (1030, output_size)
    assert jnp.allclose(out_big, reference_forward(x_big, params), atol=1e-5, rtol=1e-5)

    print("KERNEL_OK")
</pallas_src>

<mosaic_0001>
module attributes {stable_mosaic.version = 11 : i64} {
  func.func @iris_mlp_kernel(%arg0: i32, %arg1: memref<8x4xf32, #tpu.memory_space<vmem>>, %arg2: memref<4x128xf32, #tpu.memory_space<vmem>>, %arg3: memref<1x128xf32, #tpu.memory_space<vmem>>, %arg4: memref<128x128xf32, #tpu.memory_space<vmem>>, %arg5: memref<1x128xf32, #tpu.memory_space<vmem>>, %arg6: memref<128x128xf32, #tpu.memory_space<vmem>>, %arg7: memref<1x128xf32, #tpu.memory_space<vmem>>, %arg8: memref<8x128xf32, #tpu.memory_space<vmem>>) attributes {dimension_semantics = [#tpu.dimension_semantics<parallel>], iteration_bounds = array<i64: 1>, scalar_prefetch = 0 : i64, scratch_operands = 0 : i64, tpu.core_type = #tpu.core_type<tc>, window_params = [{transform_indices = @transform_0, window_bounds = array<i64: 8, 4>}, {pipeline_mode = #tpu.pipeline_mode<synchronous>, transform_indices = @transform_1, window_bounds = array<i64: 4, 128>}, {pipeline_mode = #tpu.pipeline_mode<synchronous>, transform_indices = @transform_2, window_bounds = array<i64: 1, 128>}, {pipeline_mode = #tpu.pipeline_mode<synchronous>, transform_indices = @transform_3, window_bounds = array<i64: 128, 128>}, {pipeline_mode = #tpu.pipeline_mode<synchronous>, transform_indices = @transform_4, window_bounds = array<i64: 1, 128>}, {pipeline_mode = #tpu.pipeline_mode<synchronous>, transform_indices = @transform_5, window_bounds = array<i64: 128, 128>}, {pipeline_mode = #tpu.pipeline_mode<synchronous>, transform_indices = @transform_6, window_bounds = array<i64: 1, 128>}, {transform_indices = @transform_7, window_bounds = array<i64: 8, 128>}]} {
    %c0 = arith.constant 0 : index
    %c0_0 = arith.constant 0 : index
    %0 = vector.load %arg1[%c0, %c0_0] : memref<8x4xf32, #tpu.memory_space<vmem>>, vector<8x4xf32>
    %c0_1 = arith.constant 0 : index
    %c0_2 = arith.constant 0 : index
    %1 = vector.load %arg2[%c0_1, %c0_2] : memref<4x128xf32, #tpu.memory_space<vmem>>, vector<4x128xf32>
    %cst = arith.constant dense<0.000000e+00> : vector<8x128xf32>
    %2 = tpu.matmul %0, %1, %cst {dimension_numbers = #tpu.dot_dimension_numbers<[1], [0], [0], [1], [0, 0, 1, 1], [], []>} : vector<8x4xf32>, vector<4x128xf32>, vector<8x128xf32> -> vector<8x128xf32>
    %c0_3 = arith.constant 0 : index
    %c0_4 = arith.constant 0 : index
    %3 = vector.load %arg3[%c0_3, %c0_4] : memref<1x128xf32, #tpu.memory_space<vmem>>, vector<1x128xf32>
    %4 = vector.broadcast %3 : vector<1x128xf32> to vector<8x128xf32>
    %5 = arith.addf %2, %4 : vector<8x128xf32>
    %cst_5 = arith.constant 0.000000e+00 : f32
    %6 = vector.broadcast %cst_5 : f32 to vector<8x128xf32>
    %7 = arith.maximumf %5, %6 : vector<8x128xf32>
    %c0_6 = arith.constant 0 : index
    %c0_7 = arith.constant 0 : index
    %8 = vector.load %arg4[%c0_6, %c0_7] : memref<128x128xf32, #tpu.memory_space<vmem>>, vector<128x128xf32>
    %cst_8 = arith.constant dense<0.000000e+00> : vector<8x128xf32>
    %9 = tpu.matmul %7, %8, %cst_8 {dimension_numbers = #tpu.dot_dimension_numbers<[1], [0], [0], [1], [0, 0, 1, 1], [], []>} : vector<8x128xf32>, vector<128x128xf32>, vector<8x128xf32> -> vector<8x128xf32>
    %c0_9 = arith.constant 0 : index
    %c0_10 = arith.constant 0 : index
    %10 = vector.load %arg5[%c0_9, %c0_10] : memref<1x128xf32, #tpu.memory_space<vmem>>, vector<1x128xf32>
    %11 = vector.broadcast %10 : vector<1x128xf32> to vector<8x128xf32>
    %12 = arith.addf %9, %11 : vector<8x128xf32>
    %cst_11 = arith.constant 0.000000e+00 : f32
    %13 = vector.broadcast %cst_11 : f32 to vector<8x128xf32>
    %14 = arith.maximumf %12, %13 : vector<8x128xf32>
    %c0_12 = arith.constant 0 : index
    %c0_13 = arith.constant 0 : index
    %15 = vector.load %arg6[%c0_12, %c0_13] : memref<128x128xf32, #tpu.memory_space<vmem>>, vector<128x128xf32>
    %cst_14 = arith.constant dense<0.000000e+00> : vector<8x128xf32>
    %16 = tpu.matmul %14, %15, %cst_14 {dimension_numbers = #tpu.dot_dimension_numbers<[1], [0], [0], [1], [0, 0, 1, 1], [], []>} : vector<8x128xf32>, vector<128x128xf32>, vector<8x128xf32> -> vector<8x128xf32>
    %c0_15 = arith.constant 0 : index
    %c0_16 = arith.constant 0 : index
    %17 = vector.load %arg7[%c0_15, %c0_16] : memref<1x128xf32, #tpu.memory_space<vmem>>, vector<1x128xf32>
    %18 = vector.broadcast %17 : vector<1x128xf32> to vector<8x128xf32>
    %19 = arith.addf %16, %18 : vector<8x128xf32>
    %c0_17 = arith.constant 0 : index
    %c0_18 = arith.constant 0 : index
    %20 = vector.load %arg8[%c0_17, %c0_18] : memref<8x128xf32, #tpu.memory_space<vmem>>, vector<8x128xf32>
    tpu.vector_store %arg8[%c0_17, %c0_18], %19 {strides = array<i32>} : memref<8x128xf32, #tpu.memory_space<vmem>>, vector<8x128xf32>,
    return
  }
  func.func @transform_0(%arg0: i32) -> (i32, i32) {
    %c0_i32 = arith.constant 0 : i32
    %c0_i32_0 = arith.constant 0 : i32
    return %arg0, %c0_i32 : i32, i32
  }
  func.func @transform_1(%arg0: i32) -> (i32, i32) {
    %c0_i32 = arith.constant 0 : i32
    %c0_i32_0 = arith.constant 0 : i32
    %c0_i32_1 = arith.constant 0 : i32
    return %c0_i32, %c0_i32_0 : i32, i32
  }
  func.func @transform_2(%arg0: i32) -> (i32, i32) {
    %c0_i32 = arith.constant 0 : i32
    %c0_i32_0 = arith.constant 0 : i32
    %c0_i32_1 = arith.constant 0 : i32
    return %c0_i32, %c0_i32_0 : i32, i32
  }
  func.func @transform_3(%arg0: i32) -> (i32, i32) {
    %c0_i32 = arith.constant 0 : i32
    %c0_i32_0 = arith.constant 0 : i32
    %c0_i32_1 = arith.constant 0 : i32
    return %c0_i32, %c0_i32_0 : i32, i32
  }
  func.func @transform_4(%arg0: i32) -> (i32, i32) {
    %c0_i32 = arith.constant 0 : i32
    %c0_i32_0 = arith.constant 0 : i32
    %c0_i32_1 = arith.constant 0 : i32
    return %c0_i32, %c0_i32_0 : i32, i32
  }
  func.func @transform_5(%arg0: i32) -> (i32, i32) {
    %c0_i32 = arith.constant 0 : i32
    %c0_i32_0 = arith.constant 0 : i32
    %c0_i32_1 = arith.constant 0 : i32
    return %c0_i32, %c0_i32_0 : i32, i32
  }
  func.func @transform_6(%arg0: i32) -> (i32, i32) {
    %c0_i32 = arith.constant 0 : i32
    %c0_i32_0 = arith.constant 0 : i32
    %c0_i32_1 = arith.constant 0 : i32
    return %c0_i32, %c0_i32_0 : i32, i32
  }
  func.func @transform_7(%arg0: i32) -> (i32, i32) {
    %c0_i32 = arith.constant 0 : i32
    %c0_i32_0 = arith.constant 0 : i32
    return %arg0, %c0_i32 : i32, i32
  }
}

</mosaic_0001>

<bundles_post_ra>
// kernel: tpu_custom_call.1
= control target key start
LH: loop header
LB: loop body
LE: loop exit
PB: predicated region body
PF: predicated region fallthrough
CT: control target
= control target key end

     0   :  { %12 = vsyncpa [#allocation3], 0  ;;  %s709_s0 = inlined_call_operand.vmem [shape: f32[8,4], index: 0, kind: input, shape index: {}]   ;;  %s710_s1 = inlined_call_operand.vmem [shape: f32[4,128], index: 1, kind: input, shape index: {}]   ;;  %s711_s2 = inlined_call_operand.vmem [shape: f32[1,128], index: 2, kind: input, shape index: {}]   ;;  %s712_s3 = inlined_call_operand.hbm [shape: f32[128,128], index: 3, kind: input, shape index: {}]   ;;  %s713_s4 = inlined_call_operand.vmem [shape: f32[1,128], index: 4, kind: input, shape index: {}]   ;;  %s714_s5 = inlined_call_operand.hbm [shape: f32[128,128], index: 5, kind: input, shape index: {}]   ;;  %s715_s6 = inlined_call_operand.vmem [shape: f32[1,128], index: 6, kind: input, shape index: {}]   ;;  %s716_s7 = inlined_call_operand.hbm [shape: f32[8,128], index: 7, kind: output, shape index: {}]  }
   0x1   :  { %13 = vsyncpa [#allocation6], 0 }
   0x2   :  { %14 = vsyncpa [#allocation4], 0  ;;  %s591_s24 = smov [#allocation2]   ;;  %s519_s28 = scalar_lea.hbm %s712_s3, 2048 }
   0x3   :  { %s26_s25 = sshll.u32 %s591_s24, 4  ;;  %p520_p0 = scmp.ne.s32.totalorder %s712_s3, %s519_s28  ;;  %s27_s25 = int_to_ptr.vmem [resolvable:$true] %s26_s25 }
   0x4   :  { %p523_p1 = scmp.lt.u32.totalorder %s519_s28, %s712_s3 }
   0x6   :  { %p525_p2 = pnand %p523_p1, %p520_p0 }
   0x8   :  { %528 = shalt.err (!%p525_p2)
}
   0x9   :  { %s529_s10 = scalar_lea.vmem %s27_s25, 2048  ;;  %p534_p4 = scmp.lt.s32.totalorder %s27_s25, %s27_s25 }
   0xa   :  { %p530_p3 = scmp.ne.s32.totalorder %s27_s25, %s529_s10  ;;  %p535_p5 = scmp.lt.s32.totalorder %s529_s10, %s529_s10 }
   0xc   :  { %p536_p6 = por %p535_p5, %p534_p4 }
   0xe   :  { %p537_p7 = pnand %p536_p6, %p530_p3 }
  0x10   :  { %540 = shalt.err (!%p537_p7)
}
  0x11   :  { %s592_s11 = smov 128   ;;  %s593_s12 = smov 8  }
  0x12   :  { %32 = dma.hbm_to_vmem [thread:$0]  %s712_s3, 2048, %s27_s25, [#allocation3], %s592_s11, %s592_s11, %s593_s12  }
  0x13   :  { %s594_s15 = smov [#allocation5]   ;;  %s541_s19 = scalar_lea.hbm %s714_s5, 2048 }
  0x14   :  { %s40_s16 = sshll.u32 %s594_s15, 4  ;;  %p542_p8 = scmp.ne.s32.totalorder %s714_s5, %s541_s19  ;;  %s41_s16 = int_to_ptr.vmem [resolvable:$true] %s40_s16 }
  0x15   :  { %p545_p9 = scmp.lt.u32.totalorder %s541_s19, %s714_s5 }
  0x17   :  { %p547_p10 = pnand %p545_p9, %p542_p8 }
  0x19   :  { %550 = shalt.err (!%p547_p10)
}
  0x1a   :  { %s551_s24 = scalar_lea.vmem %s41_s16, 2048  ;;  %p556_p12 = scmp.lt.s32.totalorder %s41_s16, %s41_s16 }
  0x1b   :  { %p552_p11 = scmp.ne.s32.totalorder %s41_s16, %s551_s24  ;;  %p557_p13 = scmp.lt.s32.totalorder %s551_s24, %s551_s24 }
  0x1d   :  { %p558_p0 = por %p557_p13, %p556_p12 }
  0x1f   :  { %p559_p1 = pnand %p558_p0, %p552_p11 }
  0x21   :  { %562 = shalt.err (!%p559_p1)
}
  0x22   :  { %46 = dma.hbm_to_vmem [thread:$0]  %s714_s5, 2048, %s41_s16, [#allocation6], %s592_s11, %s592_s11, %s593_s12  }
  0x23   :  { %585 = dma.done.wait [#allocation3], 2048  }
  0x24   :  { %586 = vsyncadd [#allocation3], 4294965248 }
  0x25   :  { %587 = dma.done.wait [#allocation6], 2048  }
  0x26   :  { %588 = vsyncadd [#allocation6], 4294965248  ;;  %v595_v0 = vmov 0.0   ;;  %vm596_vm0 = vmmov 0   ;;  %v597_v1 = vmov 0.0|0.0   ;;  %vm68_vm1 = vcmask 1043456  }
  0x27   :  { %388 = vmatprep.subr.mxu0 %v595_v0  ;;  %390 = vmatprep.mubr.msk.f32.mxu0 %vm596_vm0, %v595_v0  ;;  %vm64_vm2 = vcmask 31744   ;;  %v56_v2 = vld [vmem:[%s710_s1] sm:$0xf]  ;;  %v144_v5 = vld [vmem:[#allocation2 + $0x8] sm:$0xff]  ;;  %v145_v6 = vld [vmem:[#allocation2 + $0x10] sm:$0xff]  ;;  %s598_s9 = smov [#allocation7]  }
  0x28   :  { %463 = vmatprep.subr.bf16.mxu1 %v597_v1  ;;  %425 = vmatprep.mubr.msk.f32.mxu1 %vm596_vm0, %v595_v0  ;;  %v55_v3 = vld [vmem:[%s709_s0] sm:$0xff]  ;;  %v146_v7 = vld [vmem:[#allocation2 + $0x18] sm:$0xff]  ;;  %v148_v11 = vld [vmem:[#allocation2 + $0x28] sm:$0xff]  ;;  %s337_s10 = sshll.u32 %s598_s9, 4  ;;  %s338_s10 = int_to_ptr.vmem [resolvable:$true] %s337_s10 }
  0x29   :  { %v143_v4 = vld [vmem:[#allocation2] sm:$0xff]  ;;  %389 = vmatpush3.msk.msra.mxu0 %vm68_vm1, %v56_v2  ;;  %v467_v9 = vpack.c.bf16 %v146_v7, %v145_v6  ;;  %v149_v13 = vld [vmem:[#allocation2 + $0x30] sm:$0xff]  ;;  %v150_v14 = vld [vmem:[#allocation2 + $0x38] sm:$0xff]  ;;  %s563_s11 = scalar_lea.vmem %s338_s10, 128  ;;  %p568_p3 = scmp.lt.s32.totalorder %s338_s10, %s338_s10 }
  0x2a   :  { %391 = vmatmul.mubr.msk.f32.vlgmr.msra.gmra.mrb[0].mxu0 %vm64_vm2, %v55_v3  ;;  %v464_v8 = vpack.c.bf16 %v144_v5, %v143_v4  ;;  %487 = vmatprep.subr.bf16.mxu0 %v597_v1  ;;  %v147_v10 = vld [vmem:[#allocation2 + $0x20] sm:$0xff]  ;;  %v473_v15 = vpack.c.bf16 %v150_v14, %v149_v13  ;;  %v152_v17 = vld [vmem:[#allocation2 + $0x48] sm:$0xff]  ;;  %v153_v19 = vld [vmem:[#allocation2 + $0x50] sm:$0xff]  ;;  %p564_p2 = scmp.ne.s32.totalorder %s338_s10, %s563_s11  ;;  %p569_p4 = scmp.lt.s32.totalorder %s563_s11, %s563_s11 }
  0x2b   :  { %460 = vmatprep.mubr.msk.f32.mxu0 %vm596_vm0, %v595_v0  ;;  %v470_v12 = vpack.c.bf16 %v148_v11, %v147_v10  ;;  %v151_v16 = vld [vmem:[#allocation2 + $0x40] sm:$0xff]  ;;  %v154_v20 = vld [vmem:[#allocation2 + $0x58] sm:$0xff]  ;;  %v156_v23 = vld [vmem:[#allocation2 + $0x68] sm:$0xff] }
  0x2c   :  { %465 = vmatpush3.bf16.msra.mxu1 %v464_v8  ;;  %v476_v18 = vpack.c.bf16 %v152_v17, %v151_v16  ;;  %v479_v21 = vpack.c.bf16 %v154_v20, %v153_v19  ;;  %v155_v22 = vld [vmem:[#allocation2 + $0x60] sm:$0xff]  ;;  %v157_v25 = vld [vmem:[#allocation2 + $0x70] sm:$0xff]  ;;  %v158_v26 = vld [vmem:[#allocation2 + $0x78] sm:$0xff]  ;;  %p570_p5 = por %p569_p4, %p568_p3 }
  0x2d   :  { %466 = vmatprep.subr.bf16.mxu1 %v597_v1  ;;  %v482_v24 = vpack.c.bf16 %v156_v23, %v155_v22  ;;  %v485_v27 = vpack.c.bf16 %v158_v26, %v157_v25  ;;  %v237_v28 = vld [vmem:[#allocation5] sm:$0xff]  ;;  %v238_v29 = vld [vmem:[#allocation5 + $0x8] sm:$0xff]  ;;  %v239_v30 = vld [vmem:[#allocation5 + $0x10] sm:$0xff] }
  0x2e   :  { %v488_v31 = vpack.c.bf16 %v238_v29, %v237_v28  ;;  %v240_v32 = vld [vmem:[#allocation5 + $0x18] sm:$0xff]  ;;  %v241_v34 = vld [vmem:[#allocation5 + $0x20] sm:$0xff]  ;;  %v242_v35 = vld [vmem:[#allocation5 + $0x28] sm:$0xff]  ;;  %p571_p6 = pnand %p570_p5, %p564_p2 }
  0x2f   :  { %v491_v33 = vpack.c.bf16 %v240_v32, %v239_v30  ;;  %v494_v36 = vpack.c.bf16 %v242_v35, %v241_v34  ;;  %v243_v37 = vld [vmem:[#allocation5 + $0x30] sm:$0xff]  ;;  %v244_v38 = vld [vmem:[#allocation5 + $0x38] sm:$0xff]  ;;  %v245_v40 = vld [vmem:[#allocation5 + $0x40] sm:$0xff] }
  0x30   :  { %468 = vmatpush3.bf16.msra.mxu1 %v467_v9  ;;  %489 = vmatpush3.bf16.msra.mxu0 %v488_v31  ;;  %v497_v39 = vpack.c.bf16 %v244_v38, %v243_v37  ;;  %v246_v41 = vld [vmem:[#allocation5 + $0x48] sm:$0xff]  ;;  %v247_v43 = vld [vmem:[#allocation5 + $0x50] sm:$0xff]  ;;  %v248_v44 = vld [vmem:[#allocation5 + $0x58] sm:$0xff] }
  0x31   :  { %469 = vmatprep.subr.bf16.mxu1 %v597_v1  ;;  %490 = vmatprep.subr.bf16.mxu0 %v597_v1  ;;  %v500_v42 = vpack.c.bf16 %v246_v41, %v245_v40  ;;  %v503_v45 = vpack.c.bf16 %v248_v44, %v247_v43  ;;  %v249_v46 = vld [vmem:[#allocation5 + $0x60] sm:$0xff]  ;;  %v250_v47 = vld [vmem:[#allocation5 + $0x68] sm:$0xff]  ;;  %v251_v54 = vld [vmem:[#allocation5 + $0x70] sm:$0xff] }
  0x32   :  { %v506_v48 = vpack.c.bf16 %v250_v47, %v249_v46  ;;  %v347_v49 = vld [vmem:[%s711_s2] ss:$0 sm:$0xff]  ;;  %v252_v55 = vld [vmem:[#allocation5 + $0x78] sm:$0xff] }
  0x33   :  { %v509_v56 = vpack.c.bf16 %v252_v55, %v251_v54  ;;  %v350_v57 = vld [vmem:[%s713_s4] ss:$0 sm:$0xff] }
  0x34   :  { %471 = vmatpush3.bf16.msra.mxu1 %v470_v12  ;;  %492 = vmatpush3.bf16.msra.mxu0 %v491_v33  ;;  %v351_v62 = vld [vmem:[%s715_s6] ss:$0 sm:$0xff] }
  0x35   :  { %472 = vmatprep.subr.bf16.mxu1 %v597_v1  ;;  %493 = vmatprep.subr.bf16.mxu0 %v597_v1 }
  0x38   :  { %474 = vmatpush3.bf16.msra.mxu1 %v473_v15  ;;  %495 = vmatpush3.bf16.msra.mxu0 %v494_v36 }
  0x39   :  { %475 = vmatprep.subr.bf16.mxu1 %v597_v1  ;;  %496 = vmatprep.subr.bf16.mxu0 %v597_v1 }
  0x3c   :  { %477 = vmatpush3.bf16.msra.mxu1 %v476_v18  ;;  %498 = vmatpush3.bf16.msra.mxu0 %v497_v39 }
  0x3d   :  { %478 = vmatprep.subr.bf16.mxu1 %v597_v1  ;;  %499 = vmatprep.subr.bf16.mxu0 %v597_v1 }
  0x40   :  { %480 = vmatpush3.bf16.msra.mxu1 %v479_v21  ;;  %501 = vmatpush3.bf16.msra.mxu0 %v500_v42 }
  0x41   :  { %481 = vmatprep.subr.bf16.mxu1 %v597_v1  ;;  %502 = vmatprep.subr.bf16.mxu0 %v597_v1 }
  0x44   :  { %483 = vmatpush3.bf16.msra.mxu1 %v482_v24  ;;  %504 = vmatpush3.bf16.msra.mxu0 %v503_v45 }
  0x45   :  { %484 = vmatprep.subr.bf16.mxu1 %v597_v1  ;;  %505 = vmatprep.subr.bf16.mxu0 %v597_v1 }
  0x48   :  { %486 = vmatpush3.bf16.msra.mxu1 %v485_v27  ;;  %507 = vmatpush3.bf16.msra.mxu0 %v506_v48 }
  0x49   :  { %508 = vmatprep.subr.bf16.mxu0 %v597_v1 }
  0x4c   :  { %510 = vmatpush3.bf16.msra.mxu0 %v509_v56 }
  0xfd   :  { %v138_v50 = vpop.f32.mrb[0].mxu0 }
  0xfe   :  { %v139_v51 = vadd.f32 %v347_v49, %v138_v50  ;;  %v392_v52 = vpop.f32.mrb[1].mxu0 }
 0x100   :  { %v142_v53 = vmax.f32 %v139_v51, 0.0 }
 0x102   :  { %426 = vmatmul.mubr.f32.vlgmr.msra.gmra.mrb[0].mxu1 %v142_v53 }
 0x1d5   :  { %v232_v58 = vpop.f32.mrb[0].mxu1 }
 0x1d6   :  { %v233_v59 = vadd.f32 %v350_v57, %v232_v58  ;;  %v427_v60 = vpop.f32.mrb[1].mxu1 }
 0x1d8   :  { %v236_v61 = vmax.f32 %v233_v59, 0.0 }
 0x1da   :  { %461 = vmatmul.mubr.f32.vlgmr.msra.gmra.mrb[2].mxu0 %v236_v61 }
 0x2ad   :  { %v326_v63 = vpop.f32.mrb[2].mxu0 }
 0x2ae   :  { %v327_v0 = vadd.f32 %v351_v62, %v326_v63  ;;  %v462_v1 = vpop.f32.mrb[3].mxu0 }
 0x2b0   :  { %330 = vst [vmem:[#allocation7] sm:$0xff] %v327_v0 }
 0x2b1   :  { %574 = shalt.err (!%p571_p6)
}
 0x2b2   :  { %s575_s13 = scalar_lea.hbm %s716_s7, 128 }
 0x2b3   :  { %p576_p7 = scmp.ne.s32.totalorder %s716_s7, %s575_s13  ;;  %p579_p8 = scmp.lt.u32.totalorder %s575_s13, %s716_s7 }
 0x2b5   :  { %p581_p9 = pnand %p579_p8, %p576_p7 }
 0x2b7   :  { %584 = shalt.err (!%p581_p9)
}
 0x2b8   :  { %340 = dma.vmem_to_hbm [thread:$0]  %s338_s10, 128, %s716_s7, [#allocation4]  }
 0x2b9   :  { %589 = dma.done.wait [#allocation4], 128  }
 0x2ba   :  { %590 = vsyncadd [#allocation4], 4294967168 }
 0x2bb   :  { %344 = vsyncpa [#allocation3], 1 }
 0x2bc   :  { %345 = vsyncpa [#allocation6], 1 }
 0x2bd   :  { %346 = vsyncpa [#allocation4], 1 }

</bundles_post_ra>
